<compile_context>
chip_gen: v7x
topology: tpu7x:2x2x1
jax: 0.10.0
libtpu: 0.0.40
codegen_flags: <defaults>
</compile_context>

<pallas_src>
import jax
import jax.numpy as jnp
import numpy as np
from jax.experimental import pallas as pl
from jax.experimental.pallas import tpu as pltpu


# ------------------------------------------------------------------
# Fused kernel bodies
# ------------------------------------------------------------------
def _argmax_rows(logits):
    """First-maximal-index argmax along the last (class/lane) axis.

    Returns (pred (tm, 1) int32, row_max (tm, 1) f32)."""
    m = jnp.max(logits, axis=-1, keepdims=True)
    idx = jax.lax.broadcasted_iota(jnp.int32, logits.shape, 1)
    cand = jnp.where(logits == m, idx, jnp.int32(2 ** 30))  # sentinel safe for C <= 2^30
    return jnp.min(cand, axis=-1, keepdims=True), m


def _linear_accumulate(x_ref, w_ref, b_ref, acc_ref):
    """per_batch_transform: logits += x_tile @ W_tile (bf16 MXU, f32 accumulate)."""
    @pl.when(pl.program_id(1) == 0)
    def _():
        # Initialize the f32 logits accumulator with the bias (once per batch tile).
        acc_ref[...] = jnp.broadcast_to(b_ref[...], acc_ref.shape)
    acc_ref[...] += jnp.dot(x_ref[...], w_ref[...],
                            preferred_element_type=jnp.float32)


def _fused_preds_kernel(x_ref, w_ref, b_ref, pred_ref, acc_ref):
    _linear_accumulate(x_ref, w_ref, b_ref, acc_ref)

    @pl.when(pl.program_id(1) == pl.num_programs(1) - 1)
    def _():
        # serializer: argmax on logits (== argmax of softmax, softmax is monotone).
        pred, _ = _argmax_rows(acc_ref[...])
        pred_ref[...] = pred


def _fused_probs_preds_kernel(x_ref, w_ref, b_ref, probs_ref, pred_ref, acc_ref):
    _linear_accumulate(x_ref, w_ref, b_ref, acc_ref)

    @pl.when(pl.program_id(1) == pl.num_programs(1) - 1)
    def _():
        logits = acc_ref[...]
        pred, m = _argmax_rows(logits)
        # per_sample_transform: numerically-stable softmax over the class axis.
        # (Lane padding for C % 128 != 0 is handled by the compiler since the
        #  block spans the full class dim; no explicit mask needed.)
        e = jnp.exp(logits - m)
        denom = jnp.sum(e, axis=-1, keepdims=True)
        probs_ref[...] = (e * pl.reciprocal(denom, approx=True)).astype(probs_ref.dtype)
        pred_ref[...] = pred


# ------------------------------------------------------------------
# Wrapper: one pallas_call for the whole post-processing pipeline
# ------------------------------------------------------------------
def _pick_tk(H):
    # v6e/v7x MXU geometry prefers 256-wide K tiles, v5e 128; fall back to a
    # single resident K slice for small / awkward hidden sizes.
    for cand in (256, 128):
        if H % cand == 0:
            return cand
    return H


def fused_postprocess(x, w, b, *, tm=128, tk=None, return_probs=False,
                      probs_dtype=jnp.float32, compute_dtype=jnp.bfloat16):
    """linear head + (optional softmax) + argmax, fused into one pallas_call.

    x: (B, H), w: (H, C), b: (C,).
    Returns preds (B,) int32, and probs (B, C) `probs_dtype` if return_probs.
    """
    B, H = x.shape
    C = w.shape[1]
    assert w.shape[0] == H and b.shape == (C,)
    assert tm % 8 == 0

    # Feed the MXU bf16 operands (native on v5e/v6e/v7x); accumulate in f32.
    if x.dtype != compute_dtype:
        x = x.astype(compute_dtype)
    if w.dtype != compute_dtype:
        w = w.astype(compute_dtype)
    b2 = b.reshape(1, C).astype(jnp.float32)

    if tk is None:
        tk = _pick_tk(H)
    assert H % tk == 0, "hidden dim must be divisible by tk (pad weights offline otherwise)"

    n_b = pl.cdiv(B, tm)   # no jnp.pad: the trailing partial tile is handled by Pallas masking
    n_k = H // tk
    grid = (n_b, n_k)

    in_specs = [
        pl.BlockSpec((tm, tk), lambda i, k: (i, k)),   # activations tile moves with (batch, K)
        pl.BlockSpec((tk, C),  lambda i, k: (k, 0)),   # weight K-slice (re-used across batch tiles)
        pl.BlockSpec((1, C),   lambda i, k: (0, 0)),   # bias resident
    ]
    pred_spec = pl.BlockSpec((tm, 1), lambda i, k: (i, 0))        # tiny (512 B / 128-row tile) writeback
    scratch = [pltpu.VMEM((tm, C), jnp.float32)]                   # f32 logits accumulator

    # Raise the scoped-VMEM limit only when the tiles actually need it; clamp
    # to v7x's 64 MiB physical VMEM so one setting is safe on v5e/v6e/v7x.
    dsz = jnp.dtype(compute_dtype).itemsize
    est = (2 * tm * tk * dsz            # double-buffered x tiles
           + 2 * tk * C * dsz           # double-buffered W tiles
           + 2 * C * 4                  # bias
           + tm * C * 4                 # f32 accumulator
           + 2 * tm * C * jnp.dtype(probs_dtype).itemsize   # probs out buffers
           + 2 * tm * 4)                # preds out buffers
    vmem_limit = min(int(2 * est), 64 << 20) if est > (24 << 20) else None

    compiler_params = pltpu.CompilerParams(
        dimension_semantics=("parallel", "arbitrary"),   # batch shards across TCs; K is the reduction
        vmem_limit_bytes=vmem_limit)

    if return_probs:
        probs, preds = pl.pallas_call(
            _fused_probs_preds_kernel,
            out_shape=(jax.ShapeDtypeStruct((B, C), probs_dtype),
                       jax.ShapeDtypeStruct((B, 1), jnp.int32)),
            grid=grid,
            in_specs=in_specs,
            out_specs=(pl.BlockSpec((tm, C), lambda i, k: (i, 0)), pred_spec),
            scratch_shapes=scratch,
            compiler_params=compiler_params,
        )(x, w, b2)
        return preds[:, 0], probs

    preds = pl.pallas_call(
        _fused_preds_kernel,
        out_shape=jax.ShapeDtypeStruct((B, 1), jnp.int32),
        grid=grid,
        in_specs=in_specs,
        out_specs=pred_spec,
        scratch_shapes=scratch,
        compiler_params=compiler_params,
    )(x, w, b2)
    return preds[:, 0]


# ------------------------------------------------------------------
# _PostProcessor forward, mirroring the PyTorch control flow.
# The hot path (per_batch_transform -> per_sample_transform -> serializer) is
# the single fused kernel above; uncollate splits the dense device output into
# the per-sample list that the original forward returns.
# ------------------------------------------------------------------
class PostProcessor:
    def __init__(self, fused_pipeline, uncollate_fn, save_fn=None,
                 save_per_sample=False):
        # fused_pipeline == serializer . per_sample_transform . per_batch_transform
        self.fused_pipeline = fused_pipeline
        self.uncollate_fn = uncollate_fn
        self.save_fn = save_fn
        self.save_per_sample = save_per_sample

    def __call__(self, batch):
        preds_dense = self.fused_pipeline(batch)        # one kernel launch for the whole batch
        preds_host = jax.device_get(preds_dense)        # one device->host transfer
        final_preds = self.uncollate_fn(preds_host)     # list of per-sample class ids
        if self.save_fn:
            # TODO(synk): file-system save_fn has no Pallas equivalent; host-side callback.
            if self.save_per_sample:
                for pred in final_preds:
                    self.save_fn(pred)
            else:
                self.save_fn(final_preds)
        else:
            return final_preds


def uncollate(preds):
    # split the dense per-batch predictions into a list of per-sample predictions
    return [p for p in preds]


if __name__ == "__main__":
    B, H, C = 2, 32, 128

    key = jax.random.PRNGKey(0)
    kx, kw, kb = jax.random.split(key, 3)
    x = jax.random.normal(kx, (B, H), dtype=jnp.float32)          # [batch, hidden]
    W = jax.random.normal(kw, (H, C), dtype=jnp.float32) * 0.1    # deterministic "weights"
    bvec = jax.random.normal(kb, (C,), dtype=jnp.float32) * 0.01

    post = PostProcessor(
        fused_pipeline=lambda batch: fused_postprocess(batch, W, bvec),
        uncollate_fn=uncollate,
        save_fn=None,
        save_per_sample=False,
    )

    final_preds = post(x)                                          # list of B class ids (host)

    # Optional probabilities path (per_sample_transform output), only
    # materialized on request.
    preds2, probs = fused_postprocess(x, W, bvec, return_probs=True)
    preds2 = jax.block_until_ready(preds2)
    probs = jax.block_until_ready(probs)

    # Pure-JAX reference (same bf16 MXU operands, f32 accumulation).
    logits_ref = jnp.dot(x.astype(jnp.bfloat16), W.astype(jnp.bfloat16),
                         preferred_element_type=jnp.float32) + bvec
    probs_ref = jax.nn.softmax(logits_ref, axis=-1)
    labels_ref = np.asarray(jnp.argmax(logits_ref, axis=-1).astype(jnp.int32))

    assert len(final_preds) == B
    for i in range(B):
        assert int(final_preds[i]) == int(labels_ref[i]), (
            f"mismatch at sample {i}: {final_preds[i]} vs {labels_ref[i]}"
        )
    np.testing.assert_array_equal(np.asarray(preds2), labels_ref)
    np.testing.assert_allclose(np.asarray(probs), np.asarray(probs_ref),
                               rtol=2e-2, atol=2e-2)               # approx reciprocal tolerance

    print("KERNEL_OK")
</pallas_src>

<mosaic_0001>
module attributes {stable_mosaic.version = 11 : i64} {
  func.func @_fused_preds_kernel(%arg0: i32, %arg1: i32, %arg2: memref<128x32xbf16, #tpu.memory_space<vmem>>, %arg3: memref<32x128xbf16, #tpu.memory_space<vmem>>, %arg4: memref<1x128xf32, #tpu.memory_space<vmem>>, %arg5: memref<128x1xi32, #tpu.memory_space<vmem>>, %arg6: memref<128x128xf32, #tpu.memory_space<vmem>>) attributes {dimension_semantics = [#tpu.dimension_semantics<parallel>, #tpu.dimension_semantics<arbitrary>], iteration_bounds = array<i64: 1, 1>, scalar_prefetch = 0 : i64, scratch_operands = 1 : i64, tpu.core_type = #tpu.core_type<tc>, window_params = [{transform_indices = @transform_0, window_bounds = array<i64: 128, 32>}, {transform_indices = @transform_1, window_bounds = array<i64: 32, 128>}, {pipeline_mode = #tpu.pipeline_mode<synchronous>, transform_indices = @transform_2, window_bounds = array<i64: 1, 128>}, {transform_indices = @transform_3, window_bounds = array<i64: 128, 1>}]} {
    %c0_i32 = arith.constant 0 : i32
    %0 = arith.cmpi eq, %arg1, %c0_i32 : i32
    %1 = arith.extui %0 : i1 to i32
    %c0_i32_0 = arith.constant 0 : i32
    %2 = arith.cmpi ne, %1, %c0_i32_0 : i32
    scf.if %2 {
      %c0_10 = arith.constant 0 : index
      %c0_11 = arith.constant 0 : index
      %12 = vector.load %arg4[%c0_10, %c0_11] : memref<1x128xf32, #tpu.memory_space<vmem>>, vector<1x128xf32>
      %13 = vector.shape_cast %12 : vector<1x128xf32> to vector<1x128xf32>
      %14 = vector.broadcast %13 : vector<1x128xf32> to vector<128x128xf32>
      %c0_12 = arith.constant 0 : index
      %c0_13 = arith.constant 0 : index
      %15 = vector.load %arg6[%c0_12, %c0_13] : memref<128x128xf32, #tpu.memory_space<vmem>>, vector<128x128xf32>
      tpu.vector_store %arg6[%c0_12, %c0_13], %14 {strides = array<i32>} : memref<128x128xf32, #tpu.memory_space<vmem>>, vector<128x128xf32>,
    } else {
    }
    %c0 = arith.constant 0 : index
    %c0_1 = arith.constant 0 : index
    %3 = vector.load %arg6[%c0, %c0_1] : memref<128x128xf32, #tpu.memory_space<vmem>>, vector<128x128xf32>
    %c0_2 = arith.constant 0 : index
    %c0_3 = arith.constant 0 : index
    %4 = vector.load %arg2[%c0_2, %c0_3] : memref<128x32xbf16, #tpu.memory_space<vmem>>, vector<128x32xbf16>
    %c0_4 = arith.constant 0 : index
    %c0_5 = arith.constant 0 : index
    %5 = vector.load %arg3[%c0_4, %c0_5] : memref<32x128xbf16, #tpu.memory_space<vmem>>, vector<32x128xbf16>
    %cst = arith.constant dense<0.000000e+00> : vector<128x128xf32>
    %6 = tpu.matmul %4, %5, %cst {dimension_numbers = #tpu.dot_dimension_numbers<[1], [0], [0], [1], [0, 0, 1, 1], [], []>} : vector<128x32xbf16>, vector<32x128xbf16>, vector<128x128xf32> -> vector<128x128xf32>
    %7 = arith.addf %3, %6 : vector<128x128xf32>
    %c0_6 = arith.constant 0 : index
    %c0_7 = arith.constant 0 : index
    %8 = vector.load %arg6[%c0_6, %c0_7] : memref<128x128xf32, #tpu.memory_space<vmem>>, vector<128x128xf32>
    tpu.vector_store %arg6[%c0_6, %c0_7], %7 {strides = array<i32>} : memref<128x128xf32, #tpu.memory_space<vmem>>, vector<128x128xf32>,
    %c0_i32_8 = arith.constant 0 : i32
    %9 = arith.cmpi eq, %arg1, %c0_i32_8 : i32
    %10 = arith.extui %9 : i1 to i32
    %c0_i32_9 = arith.constant 0 : i32
    %11 = arith.cmpi ne, %10, %c0_i32_9 : i32
    scf.if %11 {
      %c0_10 = arith.constant 0 : index
      %c0_11 = arith.constant 0 : index
      %12 = vector.load %arg6[%c0_10, %c0_11] : memref<128x128xf32, #tpu.memory_space<vmem>>, vector<128x128xf32>
      %cst_12 = arith.constant dense<0xFF800000> : vector<128xf32>
      %13 = vector.multi_reduction <maximumf>, %12, %cst_12 [1] : vector<128x128xf32> to vector<128xf32>
      %14 = vector.shape_cast %13 : vector<128xf32> to vector<128x1xf32>
      %15 = tpu.iota {dimensions = array<i32: 1>} : vector<128x128xi32>
      %16 = vector.broadcast %14 : vector<128x1xf32> to vector<128x128xf32>
      %17 = arith.cmpf oeq, %12, %16 : vector<128x128xf32>
      %c1073741824_i32 = arith.constant 1073741824 : i32
      %18 = vector.broadcast %c1073741824_i32 : i32 to vector<128x128xi32>
      %19 = arith.select %17, %15, %18 : vector<128x128xi1>, vector<128x128xi32>
      %cst_13 = arith.constant dense<2147483647> : vector<128xi32>
      %20 = vector.multi_reduction <minsi>, %19, %cst_13 [1] : vector<128x128xi32> to vector<128xi32>
      %21 = vector.shape_cast %20 : vector<128xi32> to vector<128x1xi32>
      %c0_14 = arith.constant 0 : index
      %c0_15 = arith.constant 0 : index
      %22 = vector.load %arg5[%c0_14, %c0_15] : memref<128x1xi32, #tpu.memory_space<vmem>>, vector<128x1xi32>
      tpu.vector_store %arg5[%c0_14, %c0_15], %21 {strides = array<i32>} : memref<128x1xi32, #tpu.memory_space<vmem>>, vector<128x1xi32>,
    } else {
    }
    return
  }
  func.func @transform_0(%arg0: i32, %arg1: i32) -> (i32, i32) {
    %c0_i32 = arith.constant 0 : i32
    return %arg0, %arg1 : i32, i32
  }
  func.func @transform_1(%arg0: i32, %arg1: i32) -> (i32, i32) {
    %c0_i32 = arith.constant 0 : i32
    %c0_i32_0 = arith.constant 0 : i32
    return %arg1, %c0_i32 : i32, i32
  }
  func.func @transform_2(%arg0: i32, %arg1: i32) -> (i32, i32) {
    %c0_i32 = arith.constant 0 : i32
    %c0_i32_0 = arith.constant 0 : i32
    %c0_i32_1 = arith.constant 0 : i32
    return %c0_i32, %c0_i32_0 : i32, i32
  }
  func.func @transform_3(%arg0: i32, %arg1: i32) -> (i32, i32) {
    %c0_i32 = arith.constant 0 : i32
    %c0_i32_0 = arith.constant 0 : i32
    return %arg0, %c0_i32 : i32, i32
  }
}

</mosaic_0001>

<bundles_post_ra>
// kernel: tpu_custom_call.1
= control target key start
LH: loop header
LB: loop body
LE: loop exit
PB: predicated region body
PF: predicated region fallthrough
CT: control target
= control target key end

     0   :  { %8 = vsyncpa [#allocation4], 0  ;;  %s1552_s0 = inlined_call_operand.hbm [shape: bf16[2,32], index: 0, kind: input, shape index: {}]   ;;  %s1553_s1 = inlined_call_operand.hbm [shape: bf16[32,128], index: 1, kind: input, shape index: {}]   ;;  %s1554_s2 = inlined_call_operand.vmem [shape: f32[1,128], index: 2, kind: input, shape index: {}]   ;;  %s1555_s3 = inlined_call_operand.vmem [shape: s32[2,1], index: 3, kind: output, shape index: {}]  }
   0x1   :  { %9 = vsyncpa [#allocation6], 0 }
   0x2   :  { %14 = vsyncadd [#allocation4], 1008  ;;  %s1245_s12 = smov [#allocation3]   ;;  %s1197_s16 = scalar_lea.hbm %s1552_s0, 16 }
   0x3   :  { %s15_s13 = sshll.u32 %s1245_s12, 4  ;;  %p1198_p0 = scmp.ne.s32.totalorder %s1552_s0, %s1197_s16  ;;  %s16_s13 = int_to_ptr.vmem [resolvable:$true] %s15_s13 }
   0x4   :  { %p1201_p1 = scmp.lt.u32.totalorder %s1197_s16, %s1552_s0 }
   0x6   :  { %p1203_p2 = pnand %p1201_p1, %p1198_p0 }
   0x8   :  { %1206 = shalt.err (!%p1203_p2)
}
   0x9   :  { %s1207_s21 = scalar_lea.vmem %s16_s13, 16  ;;  %s1211_s22 = scalar_lea.vmem %s16_s13, 1024 }
   0xa   :  { %p1208_p3 = scmp.ne.s32.totalorder %s16_s13, %s1207_s21  ;;  %p1212_p4 = scmp.lt.s32.totalorder %s16_s13, %s16_s13 }
   0xb   :  { %p1213_p5 = scmp.lt.s32.totalorder %s1211_s22, %s1207_s21 }
   0xd   :  { %p1214_p6 = por %p1213_p5, %p1212_p4 }
   0xf   :  { %p1215_p7 = pnand %p1214_p6, %p1208_p3 }
  0x11   :  { %1218 = shalt.err (!%p1215_p7)
}
  0x12   :  { %s1246_s23 = smov 16   ;;  %s1247_s24 = smov 1  }
  0x13   :  { %21 = dma.hbm_to_vmem [thread:$0]  %s1552_s0, 16, %s16_s13, [#allocation4], %s1246_s23, %s1246_s23, %s1247_s24  }
  0x14   :  { %s1248_s27 = smov [#allocation5]   ;;  %s1219_s4 = scalar_lea.hbm %s1553_s1, 256 }
  0x15   :  { %s27_s28 = sshll.u32 %s1248_s27, 4  ;;  %p1220_p8 = scmp.ne.s32.totalorder %s1553_s1, %s1219_s4  ;;  %s28_s28 = int_to_ptr.vmem [resolvable:$true] %s27_s28 }
  0x16   :  { %p1223_p9 = scmp.lt.u32.totalorder %s1219_s4, %s1553_s1 }
  0x18   :  { %p1225_p10 = pnand %p1223_p9, %p1220_p8 }
  0x1a   :  { %1228 = shalt.err (!%p1225_p10)
}
  0x1b   :  { %s1229_s9 = scalar_lea.vmem %s28_s28, 256  ;;  %p1234_p12 = scmp.lt.s32.totalorder %s28_s28, %s28_s28 }
  0x1c   :  { %p1230_p11 = scmp.ne.s32.totalorder %s28_s28, %s1229_s9  ;;  %p1235_p13 = scmp.lt.s32.totalorder %s1229_s9, %s1229_s9 }
  0x1e   :  { %p1236_p0 = por %p1235_p13, %p1234_p12 }
  0x20   :  { %p1237_p1 = pnand %p1236_p0, %p1230_p11 }
  0x22   :  { %1240 = shalt.err (!%p1237_p1)
}
  0x23   :  { %s1249_s0 = smov 64   ;;  %s1250_s10 = smov 4  }
  0x24   :  { %33 = dma.hbm_to_vmem [thread:$0]  %s1553_s1, 256, %s28_s28, [#allocation6], %s1249_s0, %s1249_s0, %s1250_s10  }
  0x25   :  { %1241 = dma.done.wait [#allocation4], 1024  }
  0x26   :  { %1242 = vsyncadd [#allocation4], 4294966272 }
  0x27   :  { %1243 = dma.done.wait [#allocation6], 256  }
  0x28   :  { %1244 = vsyncadd [#allocation6], 4294967040  ;;  %v225_v0 = vlaneseq  ;;  %v1251_v1 = vmov 1966171168   ;;  %v1195_v5 = vld [vmem:[#allocation5] sm:$0xff]   ;;  %v1196_v6 = vld [vmem:[#allocation5 + $0x8] sm:$0xff]  }
  0x29   :  { %v223_v2 = vunpack.c.l.s4 %v1251_v1  ;;  %1164 = vmatprep.subr.bf16.mxu0 %v1195_v5  ;;  %1184 = vmatprep.subr.bf16.mxu1 %v1195_v5  ;;  %v86_v8 = vld [vmem:[#allocation3] sm:$0x1]  ;;  %v87_v9 = vld [vmem:[#allocation3 + $0x1] sm:$0x1]  ;;  %v88_v10 = vld [vmem:[#allocation3 + $0x2] sm:$0x1] }
  0x2a   :  { %v226_v4 = vshrl.u32 %v225_v0, 7  ;;  %1165 = vmatpush3.bf16.msra.mxu0 %v1195_v5  ;;  %1186 = vmatpush3.bf16.msra.mxu1 %v1195_v5  ;;  %v89_v11 = vld [vmem:[#allocation3 + $0x3] sm:$0x1]  ;;  %v90_v12 = vld [vmem:[#allocation3 + $0x4] sm:$0x1]  ;;  %v218_v14 = vcombine.low %v86_v8, %v87_v9  ;;  %vm622_vm0 = vcmask 261120  }
  0x2b   :  { %v224_v3 = vunpack.c.0.s8 %v223_v2  ;;  %v91_v13 = vld [vmem:[#allocation3 + $0x5] sm:$0x1]  ;;  %1166 = vmatprep.subr.bf16.mxu0 %v1196_v6  ;;  %1185 = vmatprep.subr.bf16.mxu1 %v1196_v6  ;;  %v92_v15 = vld [vmem:[#allocation3 + $0x6] sm:$0x1]  ;;  %v93_v16 = vld [vmem:[#allocation3 + $0x7] sm:$0x1]  ;;  %v219_v17 = vcombine.low %v88_v10, %v89_v11 }
  0x2c   :  { %v220_v18 = vcombine.low %v90_v12, %v91_v13  ;;  %v118_v19 = vld [vmem:[#allocation3 + $0x20] sm:$0x1]  ;;  %v221_v20 = vcombine.low %v92_v15, %v93_v16  ;;  %v119_v22 = vld [vmem:[#allocation3 + $0x21] sm:$0x1]  ;;  %v120_v23 = vld [vmem:[#allocation3 + $0x22] sm:$0x1] }
  0x2d   :  { %v1297_v7 = vsub.s32 %v224_v3, %v226_v4  ;;  %v121_v24 = vld [vmem:[#allocation3 + $0x23] sm:$0x1]  ;;  %v122_v27 = vld [vmem:[#allocation3 + $0x24] sm:$0x1]  ;;  %v123_v28 = vld [vmem:[#allocation3 + $0x25] sm:$0x1]  ;;  %v414_v30 = vcombine.low %v118_v19, %v119_v22 }
  0x2e   :  { %v124_v29 = vld [vmem:[#allocation3 + $0x26] sm:$0x1]  ;;  %v415_v31 = vcombine.low %v120_v23, %v121_v24  ;;  %1167 = vmatpush3.bf16.msra.mxu0 %v1196_v6  ;;  %1187 = vmatpush3.bf16.msra.mxu1 %v1196_v6  ;;  %v125_v33 = vld [vmem:[#allocation3 + $0x27] sm:$0x1]  ;;  %v416_v34 = vcombine.low %v122_v27, %v123_v28  ;;  %v94_v35 = vld [vmem:[#allocation3 + $0x8] sm:$0x1] }
  0x2f   :  { %v228_v21 = vrot.slane %v218_v14, %v1297_v7  ;;  %v235_v25 = vrot.slane %v219_v17, %v1297_v7  ;;  %v242_v26 = vrot.slane %v220_v18, %v1297_v7  ;;  %v249_v32 = vrot.slane %v221_v20, %v1297_v7  ;;  %v95_v36 = vld [vmem:[#allocation3 + $0x9] sm:$0x1]  ;;  %v96_v41 = vld [vmem:[#allocation3 + $0xa] sm:$0x1]  ;;  %v97_v42 = vld [vmem:[#allocation3 + $0xb] sm:$0x1] }
  0x30   :  { %v417_v38 = vcombine.low %v124_v29, %v125_v33  ;;  %v424_v39 = vrot.slane %v414_v30, %v1297_v7  ;;  %v431_v40 = vrot.slane %v415_v31, %v1297_v7  ;;  %v98_v43 = vld [vmem:[#allocation3 + $0xc] sm:$0x1]  ;;  %v438_v45 = vrot.slane %v416_v34, %v1297_v7  ;;  %v99_v46 = vld [vmem:[#allocation3 + $0xd] sm:$0x1]  ;;  %v100_v47 = vld [vmem:[#allocation3 + $0xe] sm:$0x1] }
  0x31   :  { %v250_v37 = vcombine.low %v228_v21, %v235_v25  ;;  %v251_v44 = vcombine.low %v242_v26, %v249_v32  ;;  %v101_v48 = vld [vmem:[#allocation3 + $0xf] sm:$0x1]  ;;  %v267_v49 = vcombine.low %v94_v35, %v95_v36  ;;  %v268_v50 = vcombine.low %v96_v41, %v97_v42  ;;  %v126_v55 = vld [vmem:[#allocation3 + $0x28] sm:$0x1]  ;;  %v127_v56 = vld [vmem:[#allocation3 + $0x29] sm:$0x1] }
  0x32   :  { %v445_v52 = vrot.slane %v417_v38, %v1297_v7  ;;  %v446_v53 = vcombine.low %v424_v39, %v431_v40  ;;  %v269_v54 = vcombine.low %v98_v43, %v99_v46  ;;  %v128_v57 = vld [vmem:[#allocation3 + $0x2a] sm:$0x1]  ;;  %v270_v59 = vcombine.low %v100_v47, %v101_v48  ;;  %v129_v62 = vld [vmem:[#allocation3 + $0x2b] sm:$0x1]  ;;  %v130_v63 = vld [vmem:[#allocation3 + $0x2c] sm:$0x1] }
  0x33   :  { %v258_v51 = vrot.slane %v250_v37, %v1297_v7  ;;  %v265_v58 = vrot.slane %v251_v44, %v1297_v7  ;;  %v277_v60 = vrot.slane %v267_v49, %v1297_v7  ;;  %v284_v61 = vrot.slane %v268_v50, %v1297_v7  ;;  %v131_v1 = vld [vmem:[#allocation3 + $0x2d] sm:$0x1]  ;;  %v132_v5 = vld [vmem:[#allocation3 + $0x2e] sm:$0x1]  ;;  %v133_v6 = vld [vmem:[#allocation3 + $0x2f] sm:$0x1] }
  0x34   :  { %v447_v2 = vcombine.low %v438_v45, %v445_v52  ;;  %v454_v3 = vrot.slane %v446_v53, %v1297_v7  ;;  %v291_v4 = vrot.slane %v269_v54, %v1297_v7  ;;  %v463_v8 = vcombine.low %v126_v55, %v127_v56  ;;  %v102_v9 = vld [vmem:[#allocation3 + $0x10] sm:$0x1]  ;;  %v103_v14 = vld [vmem:[#allocation3 + $0x11] sm:$0x1]  ;;  %v104_v15 = vld [vmem:[#allocation3 + $0x12] sm:$0x1] }
  0x35   :  { %v266_v10 = vcombine.low %v258_v51, %v265_v58  ;;  %v298_v11 = vrot.slane %v270_v59, %v1297_v7  ;;  %v299_v12 = vcombine.low %v277_v60, %v284_v61  ;;  %v464_v13 = vcombine.low %v128_v57, %v129_v62  ;;  %v105_v16 = vld [vmem:[#allocation3 + $0x13] sm:$0x1]  ;;  %v106_v21 = vld [vmem:[#allocation3 + $0x14] sm:$0x1]  ;;  %v107_v22 = vld [vmem:[#allocation3 + $0x15] sm:$0x1] }
  0x36   :  { %v461_v17 = vrot.slane %v447_v2, %v1297_v7  ;;  %v465_v18 = vcombine.low %v130_v63, %v131_v1  ;;  %v466_v19 = vcombine.low %v132_v5, %v133_v6  ;;  %v473_v20 = vrot.slane %v463_v8, %v1297_v7  ;;  %v108_v23 = vld [vmem:[#allocation3 + $0x16] sm:$0x1]  ;;  %v109_v27 = vld [vmem:[#allocation3 + $0x17] sm:$0x1]  ;;  %v110_v29 = vld [vmem:[#allocation3 + $0x18] sm:$0x1] }
  0x37   :  { %1168 = vmatprep.mubr.msk.bf16.mxu0 %vm622_vm0, %v266_v10  ;;  %v300_v24 = vcombine.low %v291_v4, %v298_v11  ;;  %v307_v25 = vrot.slane %v299_v12, %v1297_v7  ;;  %v480_v26 = vrot.slane %v464_v13, %v1297_v7  ;;  %v316_v28 = vcombine.low %v102_v9, %v103_v14  ;;  %v111_v30 = vld [vmem:[#allocation3 + $0x19] sm:$0x1]  ;;  %v112_v35 = vld [vmem:[#allocation3 + $0x1a] sm:$0x1]  ;;  %v113_v36 = vld [vmem:[#allocation3 + $0x1b] sm:$0x1] }
  0x38   :  { %v462_v31 = vcombine.low %v454_v3, %v461_v17  ;;  %v487_v32 = vrot.slane %v465_v18, %v1297_v7  ;;  %v494_v33 = vrot.slane %v466_v19, %v1297_v7  ;;  %v317_v34 = vcombine.low %v104_v15, %v105_v16  ;;  %v114_v41 = vld [vmem:[#allocation3 + $0x1c] sm:$0x1]  ;;  %v115_v42 = vld [vmem:[#allocation3 + $0x1d] sm:$0x1]  ;;  %v116_v43 = vld [vmem:[#allocation3 + $0x1e] sm:$0x1] }
  0x39   :  { %v314_v37 = vrot.slane %v300_v24, %v1297_v7  ;;  %v495_v38 = vcombine.low %v473_v20, %v480_v26  ;;  %v318_v39 = vcombine.low %v106_v21, %v107_v22  ;;  %v319_v40 = vcombine.low %v108_v23, %v109_v27  ;;  %v117_v47 = vld [vmem:[#allocation3 + $0x1f] sm:$0x1]  ;;  %v134_v49 = vld [vmem:[#allocation3 + $0x30] sm:$0x1]  ;;  %v135_v50 = vld [vmem:[#allocation3 + $0x31] sm:$0x1] }
  0x3a   :  { %1176 = vmatprep.mubr.msk.bf16.mxu1 %vm622_vm0, %v462_v31  ;;  %v496_v44 = vcombine.low %v487_v32, %v494_v33  ;;  %v326_v45 = vrot.slane %v316_v28, %v1297_v7  ;;  %v333_v46 = vrot.slane %v317_v34, %v1297_v7  ;;  %v365_v48 = vcombine.low %v110_v29, %v111_v30  ;;  %v136_v55 = vld [vmem:[#allocation3 + $0x32] sm:$0x1]  ;;  %v137_v56 = vld [vmem:[#allocation3 + $0x33] sm:$0x1]  ;;  %v138_v61 = vld [vmem:[#allocation3 + $0x34] sm:$0x1] }
  0x3b   :  { %v315_v51 = vcombine.low %v307_v25, %v314_v37  ;;  %v503_v52 = vrot.slane %v495_v38, %v1297_v7  ;;  %v340_v53 = vrot.slane %v318_v39, %v1297_v7  ;;  %v347_v54 = vrot.slane %v319_v40, %v1297_v7  ;;  %v139_v62 = vld [vmem:[#allocation3 + $0x35] sm:$0x1]  ;;  %v140_v63 = vld [vmem:[#allocation3 + $0x36] sm:$0x1]  ;;  %v141_v4 = vld [vmem:[#allocation3 + $0x37] sm:$0x1] }
  0x3c   :  { %v510_v57 = vrot.slane %v496_v44, %v1297_v7  ;;  %v348_v58 = vcombine.low %v326_v45, %v333_v46  ;;  %v366_v59 = vcombine.low %v112_v35, %v113_v36  ;;  %v367_v60 = vcombine.low %v114_v41, %v115_v42  ;;  %v142_v6 = vld [vmem:[#allocation3 + $0x38] sm:$0x1]  ;;  %v143_v8 = vld [vmem:[#allocation3 + $0x39] sm:$0x1]  ;;  %v144_v13 = vld [vmem:[#allocation3 + $0x3a] sm:$0x1] }
  0x3d   :  { %1169 = vmatmul.mubr.msk.bf16.vlgmr.msra.gmra.mrb[0].mxu0 %vm622_vm0, %v315_v51  ;;  %v349_v1 = vcombine.low %v340_v53, %v347_v54  ;;  %v368_v2 = vcombine.low %v116_v43, %v117_v47  ;;  %v375_v3 = vrot.slane %v365_v48, %v1297_v7  ;;  %v512_v5 = vcombine.low %v134_v49, %v135_v50  ;;  %v145_v18 = vld [vmem:[#allocation3 + $0x3b] sm:$0x1]  ;;  %v146_v19 = vld [vmem:[#allocation3 + $0x3c] sm:$0x1]  ;;  %v147_v20 = vld [vmem:[#allocation3 + $0x3d] sm:$0x1] }
  0x3e   :  { %v511_v9 = vcombine.low %v503_v52, %v510_v57  ;;  %v356_v10 = vrot.slane %v348_v58, %v1297_v7  ;;  %v382_v11 = vrot.slane %v366_v59, %v1297_v7  ;;  %v389_v12 = vrot.slane %v367_v60, %v1297_v7  ;;  %v148_v24 = vld [vmem:[#allocation3 + $0x3e] sm:$0x1]  ;;  %v149_v25 = vld [vmem:[#allocation3 + $0x3f] sm:$0x1]  ;;  %v1143_v52 = vld [vmem:[%s1554_s2] ss:$0 sm:$0xff] }
  0x3f   :  { %v363_v14 = vrot.slane %v349_v1, %v1297_v7  ;;  %v396_v15 = vrot.slane %v368_v2, %v1297_v7  ;;  %v513_v16 = vcombine.low %v136_v55, %v137_v56  ;;  %v514_v17 = vcombine.low %v138_v61, %v139_v62 }
  0x40   :  { %1177 = vmatmul.mubr.msk.bf16.vlgmr.msra.gmra.mrb[0].mxu1 %vm622_vm0, %v511_v9  ;;  %v397_v21 = vcombine.low %v375_v3, %v382_v11  ;;  %v515_v22 = vcombine.low %v140_v63, %v141_v4  ;;  %v522_v23 = vrot.slane %v512_v5, %v1297_v7  ;;  %v561_v26 = vcombine.low %v142_v6, %v143_v8 }
  0x41   :  { %v364_v27 = vcombine.low %v356_v10, %v363_v14  ;;  %v398_v28 = vcombine.low %v389_v12, %v396_v15  ;;  %v529_v29 = vrot.slane %v513_v16, %v1297_v7  ;;  %v536_v30 = vrot.slane %v514_v17, %v1297_v7 }
  0x42   :  { %v405_v31 = vrot.slane %v397_v21, %v1297_v7  ;;  %v543_v32 = vrot.slane %v515_v22, %v1297_v7  ;;  %v562_v33 = vcombine.low %v144_v13, %v145_v18  ;;  %v563_v34 = vcombine.low %v146_v19, %v147_v20 }
  0x43   :  { %1172 = vmatprep.mubr.msk.bf16.mxu0 %vm622_vm0, %v364_v27  ;;  %v412_v35 = vrot.slane %v398_v28, %v1297_v7  ;;  %v544_v36 = vcombine.low %v522_v23, %v529_v29  ;;  %v564_v37 = vcombine.low %v148_v24, %v149_v25  ;;  %v571_v38 = vrot.slane %v561_v26, %v1297_v7 }
  0x44   :  { %v545_v39 = vcombine.low %v536_v30, %v543_v32  ;;  %v578_v40 = vrot.slane %v562_v33, %v1297_v7  ;;  %v585_v41 = vrot.slane %v563_v34, %v1297_v7  ;;  %v1389_v22 = vand.u32 127, %v225_v0 }
  0x45   :  { %v413_v42 = vcombine.low %v405_v31, %v412_v35  ;;  %v552_v43 = vrot.slane %v544_v36, %v1297_v7  ;;  %v592_v44 = vrot.slane %v564_v37, %v1297_v7 }
  0x46   :  { %v559_v45 = vrot.slane %v545_v39, %v1297_v7  ;;  %v593_v46 = vcombine.low %v571_v38, %v578_v40 }
  0x47   :  { %1173 = vmatmul.mubr.msk.bf16.gmra.mrb[4].mxu0 %vm622_vm0, %v413_v42  ;;  %v594_v47 = vcombine.low %v585_v41, %v592_v44 }
  0x48   :  { %v560_v48 = vcombine.low %v552_v43, %v559_v45  ;;  %v601_v49 = vrot.slane %v593_v46, %v1297_v7 }
  0x49   :  { %v608_v50 = vrot.slane %v594_v47, %v1297_v7 }
  0x4a   :  { %1180 = vmatprep.mubr.msk.bf16.mxu1 %vm622_vm0, %v560_v48 }
  0x4b   :  { %v609_v51 = vcombine.low %v601_v49, %v608_v50 }
  0x4d   :  { %1181 = vmatmul.mubr.msk.bf16.gmra.mrb[4].mxu1 %vm622_vm0, %v609_v51 }
 0x110   :  { %v1170_v53 = vpop.f32.mrb[0].mxu0 }
 0x111   :  { %v746_v54 = vadd.f32 %v1170_v53, %v1143_v52  ;;  %v681_v55 = vpop.f32.mrb[1].mxu0 }
 0x112   :  { %v1171_v56 = vpop.f32.mrb[2].mxu0  ;;  %v744_v63 = vadd.f32 %v1143_v52, %v681_v55 }
 0x113   :  { %v1178_v57 = vpop.f32.mrb[0].mxu1  ;;  %v684_v58 = vpop.f32.mrb[3].mxu0  ;;  %799 = vmax.xlane.f32.xlu1 %v746_v54  ;;  %v747_v61 = vadd.f32 %v1171_v56, %v1143_v52 }
 0x114   :  { %v754_v59 = vadd.f32 %v1178_v57, %v1143_v52  ;;  %v713_v60 = vpop.f32.mrb[1].mxu1  ;;  %v1363_v10 = vadd.f32 %v1143_v52, %v684_v58 }
 0x115   :  { %v1179_v7 = vpop.f32.mrb[2].mxu1  ;;  %v752_v4 = vadd.f32 %v1143_v52, %v713_v60 }
 0x116   :  { %v716_v62 = vpop.f32.mrb[3].mxu1  ;;  %815 = vmax.xlane.f32.xlu0 %v754_v59  ;;  %v755_v1 = vadd.f32 %v1179_v7, %v1143_v52 }
 0x117   :  { %801 = vmax.xlane.f32.xlu1 %v747_v61  ;;  %v1358_v6 = vadd.f32 %v1143_v52, %v716_v62 }
 0x11a   :  { %795 = vmax.xlane.f32.xlu0 %v744_v63  ;;  %v1174_v2 = vpop.f32.mrb[4].mxu0 }
 0x11b   :  { %817 = vmax.xlane.f32.xlu1 %v755_v1  ;;  %v697_v3 = vpop.f32.mrb[5].mxu0  ;;  %v1365_v13 = vadd.f32 %v1174_v2, %v1143_v52 }
 0x11c   :  { %v1175_v5 = vpop.f32.mrb[6].mxu0  ;;  %v1375_v18 = vadd.f32 %v1143_v52, %v697_v3 }
 0x11d   :  { %v700_v8 = vpop.f32.mrb[7].mxu0  ;;  %v1361_v9 = vadd.f32 %v1175_v5, %v1143_v52 }
 0x11e   :  { %811 = vmax.xlane.f32.xlu0 %v752_v4  ;;  %v1369_v16 = vadd.f32 %v1143_v52, %v700_v8 }
 0x11f   :  { %813 = vmax.xlane.f32.xlu1 %v1358_v6 }
 0x120   :  { %v1182_v11 = vpop.f32.mrb[4].mxu1 }
 0x121   :  { %v729_v12 = vpop.f32.mrb[5].mxu1  ;;  %v1385_v21 = vadd.f32 %v1182_v11, %v1143_v52 }
 0x122   :  { %797 = vmax.xlane.f32.xlu0 %v1363_v10  ;;  %v1183_v14 = vpop.f32.mrb[6].mxu1  ;;  %v1377_v19 = vadd.f32 %v1143_v52, %v729_v12 }
 0x123   :  { %809 = vmax.xlane.f32.xlu1 %v1361_v9  ;;  %v732_v15 = vpop.f32.mrb[7].mxu1  ;;  %v1381_v20 = vadd.f32 %v1183_v14, %v1143_v52 }
 0x124   :  { %v1373_v17 = vadd.f32 %v1143_v52, %v732_v15 }
 0x126   :  { %807 = vmax.xlane.f32.xlu0 %v1365_v13 }
 0x127   :  { %805 = vmax.xlane.f32.xlu1 %v1369_v16 }
 0x12a   :  { %803 = vmax.xlane.f32.xlu0 %v1375_v18 }
 0x12b   :  { %821 = vmax.xlane.f32.xlu1 %v1373_v17 }
 0x12e   :  { %819 = vmax.xlane.f32.xlu0 %v1377_v19 }
 0x12f   :  { %825 = vmax.xlane.f32.xlu1 %v1381_v20 }
 0x132   :  { %823 = vmax.xlane.f32.xlu0 %v1385_v21 }
 0x1a0   :  { %v800_v23 = vpop.xlane.xlu1 %799 }
 0x1a1   :  { %vm831_vm1 = vcmp.eq.f32.partialorder %v746_v54, %v800_v23 }
 0x1a2   :  { %v1392_v24 = vsel %vm831_vm1, %v1389_v22, 1073741824 }
 0x1a3   :  { %v816_v25 = vpop.xlane.xlu0 %815  ;;  %v890_v26 = vshra.s32 %v1392_v24, 16 }
 0x1a4   :  { %vm839_vm2 = vcmp.eq.f32.partialorder %v754_v59, %v816_v25  ;;  %v802_v27 = vpop.xlane.xlu1 %801 }
 0x1a5   :  { %v1396_v28 = vsel %vm839_vm2, %v1389_v22, 1073741824  ;;  %vm832_vm3 = vcmp.eq.f32.partialorder %v747_v61, %v802_v27  ;;  %v1398_v29 = vcvt.s32.f32 %v890_v26 }
 0x1a6   :  { %v1401_v30 = vsel %vm832_vm3, %v1389_v22, 1073741824  ;;  %v1002_v0 = vshra.s32 %v1396_v28, 16  ;;  %v1001_v25 = vand.u32 65535, %v1396_v28 }
 0x1a7   :  { %v796_v31 = vpop.xlane.xlu0 %795  ;;  %893 = vmin.xlane.f32.xlu0 %v1398_v29  ;;  %v904_v32 = vshra.s32 %v1401_v30, 16  ;;  %v903_v26 = vand.u32 65535, %v1401_v30 }
 0x1a8   :  { %vm829_vm4 = vcmp.eq.f32.partialorder %v744_v63, %v796_v31  ;;  %v818_v33 = vpop.xlane.xlu1 %817  ;;  %v1411_v36 = vcvt.s32.f32 %v1002_v0 }
 0x1a9   :  { %v1407_v34 = vsel %vm829_vm4, %v1389_v22, 1073741824  ;;  %vm840_vm5 = vcmp.eq.f32.partialorder %v755_v1, %v818_v33  ;;  %v1409_v35 = vcvt.s32.f32 %v904_v32 }
 0x1aa   :  { %v1414_v37 = vsel %vm840_vm5, %v1389_v22, 1073741824  ;;  %v862_v38 = vshra.s32 %v1407_v34, 16  ;;  %v861_v32 = vand.u32 65535, %v1407_v34 }
 0x1ab   :  { %v812_v39 = vpop.xlane.xlu0 %811  ;;  %907 = vmin.xlane.f32.xlu1 %v1409_v35  ;;  %1005 = vmin.xlane.f32.xlu0 %v1411_v36  ;;  %v1016_v40 = vshra.s32 %v1414_v37, 16  ;;  %v1015_v33 = vand.u32 65535, %v1414_v37 }
 0x1ac   :  { %vm837_vm6 = vcmp.eq.f32.partialorder %v752_v4, %v812_v39  ;;  %v814_v41 = vpop.xlane.xlu1 %813  ;;  %v1425_v44 = vcvt.s32.f32 %v862_v38 }
 0x1ad   :  { %v1421_v42 = vsel %vm837_vm6, %v1389_v22, 1073741824  ;;  %v1423_v43 = vcvt.s32.f32 %v1016_v40  ;;  %vm838_vm7 = vcmp.eq.f32.partialorder %v1358_v6, %v814_v41  ;;  %v905_v40 = vcvt.s32.f32 %v903_v26 }
 0x1ae   :  { %v974_v45 = vshra.s32 %v1421_v42, 16  ;;  %v1433_v48 = vsel %vm838_vm7, %v1389_v22, 1073741824  ;;  %v1003_v41 = vcvt.s32.f32 %v1001_v25  ;;  %v1017_v34 = vcvt.s32.f32 %v1015_v33 }
 0x1af   :  { %v798_v46 = vpop.xlane.xlu0 %797  ;;  %1019 = vmin.xlane.f32.xlu1 %v1423_v43  ;;  %865 = vmin.xlane.f32.xlu0 %v1425_v44  ;;  %v988_v55 = vshra.s32 %v1433_v48, 16 }
 0x1b0   :  { %vm830_vm8 = vcmp.eq.f32.partialorder %v1363_v10, %v798_v46  ;;  %v810_v47 = vpop.xlane.xlu1 %809  ;;  %v1438_v50 = vcvt.s32.f32 %v974_v45  ;;  %v863_v46 = vcvt.s32.f32 %v861_v32 }
 0x1b1   :  { %v1436_v49 = vsel %vm830_vm8, %v1389_v22, 1073741824  ;;  %vm836_vm9 = vcmp.eq.f32.partialorder %v1361_v9, %v810_v47  ;;  %v1457_v60 = vcvt.s32.f32 %v988_v55 }
 0x1b2   :  { %v876_v51 = vshra.s32 %v1436_v49, 16  ;;  %v1448_v56 = vsel %vm836_vm9, %v1389_v22, 1073741824 }
 0x1b3   :  { %v808_v52 = vpop.xlane.xlu0 %807  ;;  %977 = vmin.xlane.f32.xlu0 %v1438_v50  ;;  %v960_v62 = vshra.s32 %v1448_v56, 16 }
 0x1b4   :  { %vm835_vm10 = vcmp.eq.f32.partialorder %v1365_v13, %v808_v52  ;;  %v1444_v53 = vcvt.s32.f32 %v876_v51  ;;  %v806_v54 = vpop.xlane.xlu1 %805  ;;  %v987_v52 = vand.u32 65535, %v1433_v48 }
 0x1b5   :  { %v1451_v57 = vsel %vm835_vm10, %v1389_v22, 1073741824  ;;  %vm834_vm11 = vcmp.eq.f32.partialorder %v1369_v16, %v806_v54  ;;  %v1473_v4 = vcvt.s32.f32 %v960_v62 }
 0x1b6   :  { %879 = vmin.xlane.f32.xlu1 %v1444_v53  ;;  %v946_v58 = vshra.s32 %v1451_v57, 16  ;;  %v1463_v63 = vsel %vm834_vm11, %v1389_v22, 1073741824  ;;  %v945_v54 = vand.u32 65535, %v1451_v57  ;;  %v989_v62 = vcvt.s32.f32 %v987_v52 }
 0x1b7   :  { %v804_v59 = vpop.xlane.xlu0 %803  ;;  %v932_v8 = vshra.s32 %v1463_v63, 16 }
 0x1b8   :  { %vm833_vm12 = vcmp.eq.f32.partialorder %v1375_v18, %v804_v59  ;;  %v1459_v61 = vcvt.s32.f32 %v946_v58  ;;  %v822_v7 = vpop.xlane.xlu1 %821 }
 0x1b9   :  { %v1466_v1 = vsel %vm833_vm12, %v1389_v22, 1073741824  ;;  %vm842_vm13 = vcmp.eq.f32.partialorder %v1373_v17, %v822_v7  ;;  %v1489_v13 = vcvt.s32.f32 %v932_v8 }
 0x1ba   :  { %991 = vmin.xlane.f32.xlu1 %v1457_v60  ;;  %949 = vmin.xlane.f32.xlu0 %v1459_v61  ;;  %v918_v2 = vshra.s32 %v1466_v1, 16  ;;  %v1479_v9 = vsel %vm842_vm13, %v1389_v22, 1073741824  ;;  %v917_v58 = vand.u32 65535, %v1466_v1 }
 0x1bb   :  { %v820_v3 = vpop.xlane.xlu0 %819  ;;  %v1044_v15 = vshra.s32 %v1479_v9, 16 }
 0x1bc   :  { %vm841_vm14 = vcmp.eq.f32.partialorder %v1377_v19, %v820_v3  ;;  %v1475_v5 = vcvt.s32.f32 %v918_v2  ;;  %v826_v6 = vpop.xlane.xlu1 %825  ;;  %v919_v1 = vcvt.s32.f32 %v917_v58 }
 0x1bd   :  { %v1482_v10 = vsel %vm841_vm14, %v1389_v22, 1073741824  ;;  %vm844_vm15 = vcmp.eq.f32.partialorder %v1381_v20, %v826_v6  ;;  %v1503_v19 = vcvt.s32.f32 %v1044_v15 }
 0x1be   :  { %963 = vmin.xlane.f32.xlu1 %v1473_v4  ;;  %921 = vmin.xlane.f32.xlu0 %v1475_v5  ;;  %v1030_v11 = vshra.s32 %v1482_v10, 16  ;;  %v1495_v16 = vsel %vm844_vm15, %v1389_v22, 1073741824  ;;  %v1029_v2 = vand.u32 65535, %v1482_v10 }
 0x1bf   :  { %v824_v12 = vpop.xlane.xlu0 %823 }
 0x1c0   :  { %vm843_vm0 = vcmp.eq.f32.partialorder %v1385_v21, %v824_v12  ;;  %v1491_v14 = vcvt.s32.f32 %v1030_v11  ;;  %v1072_v21 = vshra.s32 %v1495_v16, 16  ;;  %v1031_v10 = vcvt.s32.f32 %v1029_v2 }
 0x1c1   :  { %v1498_v17 = vsel %vm843_vm0, %v1389_v22, 1073741824  ;;  %v889_v22 = vand.u32 65535, %v1392_v24 }
 0x1c2   :  { %935 = vmin.xlane.f32.xlu1 %v1489_v13  ;;  %1033 = vmin.xlane.f32.xlu0 %v1491_v14  ;;  %v1058_v18 = vshra.s32 %v1498_v17, 16  ;;  %v1510_v23 = vcvt.s32.f32 %v1072_v21  ;;  %v1057_v11 = vand.u32 65535, %v1498_v17 }
 0x1c3   :  { %v891_v0 = vcvt.s32.f32 %v889_v22 }
 0x1c4   :  { %v1505_v20 = vcvt.s32.f32 %v1058_v18 }
 0x1c6   :  { %1047 = vmin.xlane.f32.xlu1 %v1503_v19  ;;  %1061 = vmin.xlane.f32.xlu0 %v1505_v20 }
 0x1ca   :  { %1075 = vmin.xlane.f32.xlu1 %v1510_v23 }
 0x234   :  { %v894_v27 = vpop.xlane.xlu0 %893 }
 0x235   :  { %vm895_vm1 = vcmp.eq.f32.partialorder %v1398_v29, %v894_v27  ;;  %v973_v29 = vand.u32 65535, %v1421_v42 }
 0x236   :  { %v896_v31 = vsel %vm895_vm1, %v891_v0, inf  ;;  %vm1085_vm1 = vcmask 7168  }
 0x237   :  { %897 = vmin.xlane.f32.xlu0 %v896_v31  ;;  %v975_v51 = vcvt.s32.f32 %v973_v29 }
 0x238   :  { %v908_v38 = vpop.xlane.xlu1 %907  ;;  %v1006_v39 = vpop.xlane.xlu0 %1005 }
 0x239   :  { %vm909_vm2 = vcmp.eq.f32.partialorder %v1409_v35, %v908_v38  ;;  %vm1007_vm3 = vcmp.eq.f32.partialorder %v1411_v36, %v1006_v39  ;;  %v875_v36 = vand.u32 65535, %v1436_v49  ;;  %v959_v49 = vand.u32 65535, %v1448_v56 }
 0x23a   :  { %v910_v24 = vsel %vm909_vm2, %v905_v40, inf  ;;  %v1008_v28 = vsel %vm1007_vm3, %v1003_v41, inf }
 0x23b   :  { %911 = vmin.xlane.f32.xlu1 %v910_v24  ;;  %1009 = vmin.xlane.f32.xlu0 %v1008_v28  ;;  %v961_v6 = vcvt.s32.f32 %v959_v49 }
 0x23c   :  { %v1020_v30 = vpop.xlane.xlu1 %1019  ;;  %v1522_v45 = vpop.xlane.xlu0 %865 }
 0x23d   :  { %vm1021_vm4 = vcmp.eq.f32.partialorder %v1423_v43, %v1020_v30  ;;  %vm867_vm5 = vcmp.eq.f32.partialorder %v1425_v44, %v1522_v45  ;;  %v877_v43 = vcvt.s32.f32 %v875_v36  ;;  %v872_v32 = vcvt.f32.s32 %v1522_v45 }
 0x23e   :  { %v1022_v37 = vsel %vm1021_vm4, %v1017_v34, inf  ;;  %v868_v35 = vsel %vm867_vm5, %v863_v46, inf }
 0x23f   :  { %1023 = vmin.xlane.f32.xlu1 %v1022_v37  ;;  %869 = vmin.xlane.f32.xlu0 %v868_v35  ;;  %v873_v38 = vshll.u32 %v872_v32, 16 }
 0x240   :  { %v978_v47 = vpop.xlane.xlu0 %977 }
 0x241   :  { %vm979_vm6 = vcmp.eq.f32.partialorder %v1438_v50, %v978_v47  ;;  %v947_v50 = vcvt.s32.f32 %v945_v54 }
 0x242   :  { %v980_v42 = vsel %vm979_vm6, %v975_v51, inf }
 0x243   :  { %v880_v55 = vpop.xlane.xlu1 %879  ;;  %981 = vmin.xlane.f32.xlu0 %v980_v42 }
 0x244   :  { %vm881_vm7 = vcmp.eq.f32.partialorder %v1444_v53, %v880_v55  ;;  %v931_v53 = vand.u32 65535, %v1463_v63 }
 0x245   :  { %v882_v44 = vsel %vm881_vm7, %v877_v43, inf }
 0x246   :  { %883 = vmin.xlane.f32.xlu1 %v882_v44  ;;  %v933_v15 = vcvt.s32.f32 %v931_v53 }
 0x247   :  { %v992_v59 = vpop.xlane.xlu1 %991  ;;  %v950_v7 = vpop.xlane.xlu0 %949 }
 0x248   :  { %vm993_vm8 = vcmp.eq.f32.partialorder %v1457_v60, %v992_v59  ;;  %vm951_vm9 = vcmp.eq.f32.partialorder %v1459_v61, %v950_v7  ;;  %v1043_v61 = vand.u32 65535, %v1479_v9  ;;  %v1059_v9 = vcvt.s32.f32 %v1057_v11 }
 0x249   :  { %v994_v48 = vsel %vm993_vm8, %v989_v62, inf  ;;  %v952_v57 = vsel %vm951_vm9, %v947_v50, inf }
 0x24a   :  { %995 = vmin.xlane.f32.xlu1 %v994_v48  ;;  %953 = vmin.xlane.f32.xlu0 %v952_v57  ;;  %v1045_v25 = vcvt.s32.f32 %v1043_v61 }
 0x24b   :  { %v964_v3 = vpop.xlane.xlu1 %963  ;;  %v922_v56 = vpop.xlane.xlu0 %921 }
 0x24c   :  { %vm965_vm10 = vcmp.eq.f32.partialorder %v1473_v4, %v964_v3  ;;  %vm923_vm11 = vcmp.eq.f32.partialorder %v1475_v5, %v922_v56  ;;  %v1071_v5 = vand.u32 65535, %v1495_v16 }
 0x24d   :  { %v966_v8 = vsel %vm965_vm10, %v961_v6, inf  ;;  %v924_v60 = vsel %vm923_vm11, %v919_v1, inf }
 0x24e   :  { %967 = vmin.xlane.f32.xlu1 %v966_v8  ;;  %925 = vmin.xlane.f32.xlu0 %v924_v60 }
 0x24f   :  { %v936_v12 = vpop.xlane.xlu1 %935  ;;  %v1034_v63 = vpop.xlane.xlu0 %1033 }
 0x250   :  { %vm937_vm12 = vcmp.eq.f32.partialorder %v1489_v13, %v936_v12  ;;  %vm1035_vm13 = vcmp.eq.f32.partialorder %v1491_v14, %v1034_v63  ;;  %v1073_v14 = vcvt.s32.f32 %v1071_v5 }
 0x251   :  { %v938_v18 = vsel %vm937_vm12, %v933_v15, inf  ;;  %v1036_v4 = vsel %vm1035_vm13, %v1031_v10, inf }
 0x252   :  { %939 = vmin.xlane.f32.xlu1 %v938_v18  ;;  %1037 = vmin.xlane.f32.xlu0 %v1036_v4 }
 0x253   :  { %v1048_v21 = vpop.xlane.xlu1 %1047  ;;  %v1062_v22 = vpop.xlane.xlu0 %1061 }
 0x254   :  { %vm1049_vm14 = vcmp.eq.f32.partialorder %v1503_v19, %v1048_v21  ;;  %vm1063_vm15 = vcmp.eq.f32.partialorder %v1505_v20, %v1062_v22 }
 0x255   :  { %v1050_v17 = vsel %vm1049_vm14, %v1045_v25, inf  ;;  %v1064_v26 = vsel %vm1063_vm15, %v1059_v9, inf }
 0x256   :  { %1051 = vmin.xlane.f32.xlu1 %v1050_v17  ;;  %1065 = vmin.xlane.f32.xlu0 %v1064_v26 }
 0x257   :  { %v1076_v13 = vpop.xlane.xlu1 %1075 }
 0x258   :  { %vm1077_vm0 = vcmp.eq.f32.partialorder %v1510_v23, %v1076_v13 }
 0x259   :  { %v1078_v27 = vsel %vm1077_vm0, %v1073_v14, inf }
 0x25a   :  { %1079 = vmin.xlane.f32.xlu1 %v1078_v27 }
 0x2c4   :  { %v898_v0 = vpop.xlane.xlu0 %897 }
 0x2c8   :  { %v912_v16 = vpop.xlane.xlu1 %911  ;;  %v1010_v31 = vpop.xlane.xlu0 %1009 }
 0x2cc   :  { %v1024_v33 = vpop.xlane.xlu1 %1023  ;;  %v870_v19 = vpop.xlane.xlu0 %869 }
 0x2cd   :  { %v871_v20 = vcvt.f32.s32 %v870_v19 }
 0x2cf   :  { %v874_v39 = vadd.s32 %v873_v38, %v871_v20 }
 0x2d0   :  { %v982_v40 = vpop.xlane.xlu0 %981 }
 0x2d1   :  { %1086 = vst.msk [vmem:[#allocation7] sm:$0xff] %vm1085_vm1, %v874_v39 }
 0x2d3   :  { %v884_v41 = vpop.xlane.xlu1 %883 }
 0x2d7   :  { %v996_v24 = vpop.xlane.xlu1 %995  ;;  %v954_v28 = vpop.xlane.xlu0 %953 }
 0x2d8   :  { %v1119_v29 = vld [vmem:[#allocation7] sm:$0x3] }
 0x2d9   :  { %1120 = vst [vmem:[%s1555_s3] sm:$0x3] %v1119_v29 }
 0x2db   :  { %v968_v23 = vpop.xlane.xlu1 %967  ;;  %v926_v30 = vpop.xlane.xlu0 %925 }
 0x2df   :  { %v940_v34 = vpop.xlane.xlu1 %939  ;;  %v1038_v46 = vpop.xlane.xlu0 %1037 }
 0x2e3   :  { %v1052_v45 = vpop.xlane.xlu1 %1051  ;;  %v1066_v37 = vpop.xlane.xlu0 %1065 }
 0x2e7   :  { %v1080_v35 = vpop.xlane.xlu1 %1079 }
 0x2e8   :  { %1137 = vsyncpa [#allocation4], 1 }
 0x2e9   :  { %1138 = vsyncpa [#allocation6], 1 }

</bundles_post_ra>
